<compile_context>
chip_gen: v7x
topology: tpu7x:2x2x1
jax: 0.10.0
libtpu: 0.0.40
codegen_flags: <defaults>
</compile_context>

<pallas_src>
import functools

import jax
import jax.numpy as jnp
from jax.experimental import pallas as pl
from jax.experimental.pallas import tpu as pltpu


def _round_up(x, m):
    return (x + m - 1) // m * m


def _cnn_multitask_kernel(
    emb_ref,        # (TB, TS, E)   bf16  embedded tokens (tile)
    wcat_ref,       # (E, F3p)      bf16  fused conv0|conv1|conv2 weights (zero-padded)
    bcat_ref,       # (1, F3p)      f32   fused conv biases (zero-padded)
    wfc_ref,        # (F3p, H)      f32   fc weight (padded rows are zero)
    bfc_ref,        # (1, H)        f32
    whd_ref,        # (H, 2)        f32   [polarity | helpfulness] head weights
    bhd_ref,        # (1, 2)        f32
    out_ref,        # (TB, 2)       f32   sigmoid outputs
    pool_acc,       # (TB, F3p)     f32   scratch: running max over seq tiles
    *,
    seq_len,        # true (unpadded) sequence length (static)
    mask_seq,       # static bool: seq padding present -> mask it out of the max
):
    s = pl.program_id(1)

    @pl.when(s == 0)
    def _():
        pool_acc[...] = jnp.full_like(pool_acc, -jnp.inf)

    emb = emb_ref[...]                                   # (TB, TS, E) bf16
    TB, TS, E = emb.shape
    x = emb.reshape(TB * TS, E)

    # Fused conv0/1/2: one bf16 MXU matmul with f32 accumulation.
    c = jnp.dot(x, wcat_ref[...], preferred_element_type=jnp.float32)
    c = jnp.maximum(c + bcat_ref[...], 0.0)              # bias + ReLU (pre-pool)
    c = c.reshape(TB, TS, -1)                            # (TB, TS, F3p)

    if mask_seq:
        pos = jax.lax.broadcasted_iota(jnp.int32, (1, TS, 1), 1) + s * TS
        c = jnp.where(pos < seq_len, c, -jnp.inf)        # exclude seq padding from max

    # Incremental max-pool over the sequence (running max across seq tiles).
    pool_acc[...] = jnp.maximum(pool_acc[...], jnp.max(c, axis=1))

    @pl.when(s == pl.num_programs(1) - 1)
    def _():
        cat = pool_acc[...]                              # (TB, F3p); dropout = identity (eval)
        h = jnp.dot(cat, wfc_ref[...], preferred_element_type=jnp.float32) + bfc_ref[...]
        h = jnp.maximum(h, 0.0)                          # (TB, H)
        logits = jnp.dot(h, whd_ref[...], preferred_element_type=jnp.float32) + bhd_ref[...]
        out_ref[...] = jax.nn.sigmoid(logits)            # (TB, 2)


def cnn_multitask_forward(text, params, *, tb=128, ts=64):
    """text: (B, S) int32 token ids.  Returns (polarity, helpfulness), each (B, 1)."""
    vectors = params["vectors"].astype(jnp.bfloat16)     # frozen table, bf16 for HBM traffic
    B, S = text.shape
    E = vectors.shape[1]
    F = params["w0"].shape[1]
    H = params["wfc"].shape[1]
    F3 = 3 * F
    F3p = _round_up(F3, 128)                             # lane-dense / MXU-friendly

    # Tile sizes (aligned to (8,128) rules; sized with v7x's 64 MiB VMEM in mind).
    TB = min(tb, _round_up(B, 8))
    B_pad = _round_up(B, TB)
    TS = min(ts, _round_up(S, 8))
    S_pad = _round_up(S, TS)
    mask_seq = S_pad != S

    # Pad token ids; padded batch rows are sliced off, padded seq cols are masked.
    text_p = jnp.pad(text, ((0, B_pad - B), (0, S_pad - S)))
    embedded = vectors[text_p]                           # (B_pad, S_pad, E) bf16 gather (XLA)

    # Fuse the three conv weights into one (E, 3F) matmul; zero-pad to F3p so the
    # padded filters contribute nothing (bias 0 -> relu 0 -> zero wfc rows).
    wcat = jnp.concatenate([params["w0"], params["w1"], params["w2"]], axis=1)
    wcat = jnp.pad(wcat, ((0, 0), (0, F3p - F3))).astype(jnp.bfloat16)
    bcat = jnp.concatenate([params["b0"], params["b1"], params["b2"]], axis=1)
    bcat = jnp.pad(bcat, ((0, 0), (0, F3p - F3))).astype(jnp.float32)
    wfc = jnp.pad(params["wfc"], ((0, F3p - F3), (0, 0))).astype(jnp.float32)
    bfc = params["bfc"].astype(jnp.float32)
    # Fuse the two 1-wide heads into a single (H, 2) matmul.
    whd = jnp.concatenate([params["wp"], params["wh"]], axis=1).astype(jnp.float32)
    bhd = jnp.concatenate([params["bp"], params["bh"]], axis=1).astype(jnp.float32)

    nb, ns = B_pad // TB, S_pad // TS

    kernel = functools.partial(_cnn_multitask_kernel, seq_len=S, mask_seq=mask_seq)

    cost = pl.CostEstimate(
        flops=2 * B_pad * S_pad * E * F3p + 2 * B_pad * F3p * H + 2 * B_pad * H * 2,
        transcendentals=2 * B_pad,
        bytes_accessed=(B_pad * S_pad * E * 2 + E * F3p * 2 + F3p * 4
                        + F3p * H * 4 + H * 4 + H * 2 * 4 + 2 * 4
                        + B_pad * 2 * 4),
    )

    out = pl.pallas_call(
        kernel,
        out_shape=jax.ShapeDtypeStruct((B_pad, 2), jnp.float32),
        grid_spec=pltpu.PrefetchScalarGridSpec(
            num_scalar_prefetch=0,
            grid=(nb, ns),
            in_specs=[
                pl.BlockSpec((TB, TS, E), lambda b, s: (b, s, 0)),   # embedded tile
                pl.BlockSpec((E, F3p), lambda b, s: (0, 0)),         # weights stay resident
                pl.BlockSpec((1, F3p), lambda b, s: (0, 0)),
                pl.BlockSpec((F3p, H), lambda b, s: (0, 0)),
                pl.BlockSpec((1, H), lambda b, s: (0, 0)),
                pl.BlockSpec((H, 2), lambda b, s: (0, 0)),
                pl.BlockSpec((1, 2), lambda b, s: (0, 0)),
            ],
            out_specs=pl.BlockSpec((TB, 2), lambda b, s: (b, 0)),    # resident across seq axis
            scratch_shapes=[pltpu.VMEM((TB, F3p), jnp.float32)],
        ),
        compiler_params=pltpu.CompilerParams(
            dimension_semantics=("parallel", "arbitrary"),
        ),
        cost_estimate=cost,
    )(embedded, wcat, bcat, wfc, bfc, whd, bhd)

    out = out[:B]
    return out[:, 0:1], out[:, 1:2]


def cnn_multitask_reference(text, params):
    """Pure-JAX f32 reference matching the PyTorch forward (eval-mode dropout)."""
    emb = params["vectors"][text]                        # (B, S, E) f32
    B, S, E = emb.shape
    x = emb.reshape(B * S, E)

    def conv_relu_pool(w, b):
        c = jnp.maximum(x @ w + b, 0.0).reshape(B, S, -1)
        return jnp.max(c, axis=1)

    cat = jnp.concatenate(
        [conv_relu_pool(params["w0"], params["b0"]),
         conv_relu_pool(params["w1"], params["b1"]),
         conv_relu_pool(params["w2"], params["b2"])], axis=1)
    h = jnp.maximum(cat @ params["wfc"] + params["bfc"], 0.0)
    pol = jax.nn.sigmoid(h @ params["wp"] + params["bp"])
    hlp = jax.nn.sigmoid(h @ params["wh"] + params["bh"])
    return pol, hlp


def init_params(key, vocab_size, embedding_dim, n_filters, n_convs=3, hidden=32):
    ks = jax.random.split(key, 12)
    f32 = jnp.float32
    p = {}
    # Frozen embedding table (torch.rand equivalent: uniform [0,1)).
    p["vectors"] = jax.random.uniform(ks[0], (vocab_size, embedding_dim), dtype=f32)
    # Conv2d weights (F,1,1,E) stored directly as (E,F) for the matmul form.
    for i, (kw, kb) in enumerate([(ks[1], ks[2]), (ks[3], ks[4]), (ks[5], ks[6])]):
        p[f"w{i}"] = 0.1 * jax.random.normal(kw, (embedding_dim, n_filters), dtype=f32)
        p[f"b{i}"] = 0.1 * jax.random.normal(kb, (1, n_filters), dtype=f32)
    # fc: Linear(3*F -> hidden), stored as (in, out).
    p["wfc"] = 0.1 * jax.random.normal(ks[7], (n_convs * n_filters, hidden), dtype=f32)
    p["bfc"] = 0.1 * jax.random.normal(ks[8], (1, hidden), dtype=f32)
    # heads: Linear(hidden -> 1).
    p["wp"] = 0.1 * jax.random.normal(ks[9], (hidden, 1), dtype=f32)
    p["bp"] = jnp.zeros((1, 1), dtype=f32)
    p["wh"] = 0.1 * jax.random.normal(ks[10], (hidden, 1), dtype=f32)
    p["bh"] = jnp.zeros((1, 1), dtype=f32)
    return p


if __name__ == "__main__":
    # Small, module-consistent shapes.
    vocab_size = 50
    embedding_dim = 32     # stand-in for 300
    n_filters = 16         # stand-in for 100
    batch, seq = 2, 8

    key = jax.random.PRNGKey(0)
    k_param, k_text = jax.random.split(key)
    params = init_params(k_param, vocab_size, embedding_dim, n_filters)
    text = jax.random.randint(k_text, (batch, seq), 0, vocab_size, dtype=jnp.int32)

    polarity, helpfulness = jax.jit(cnn_multitask_forward)(text, params)
    jax.block_until_ready((polarity, helpfulness))

    assert polarity.shape == (batch, 1) and helpfulness.shape == (batch, 1)
    assert bool(jnp.all((polarity >= 0) & (polarity <= 1)))
    assert bool(jnp.all((helpfulness >= 0) & (helpfulness <= 1)))

    # bf16 matmul inputs with f32 accumulation -> small tolerance vs f32 reference.
    pol_ref, hlp_ref = cnn_multitask_reference(text, params)
    assert bool(jnp.allclose(polarity, pol_ref, atol=2e-2, rtol=2e-2))
    assert bool(jnp.allclose(helpfulness, hlp_ref, atol=2e-2, rtol=2e-2))
    print("KERNEL_OK")
</pallas_src>

<mosaic_0001>
module attributes {stable_mosaic.version = 11 : i64} {
  func.func @_cnn_multitask_kernel(%arg0: i32, %arg1: i32, %arg2: memref<8x8x32xbf16, #tpu.memory_space<vmem>>, %arg3: memref<32x128xbf16, #tpu.memory_space<vmem>>, %arg4: memref<1x128xf32, #tpu.memory_space<vmem>>, %arg5: memref<128x32xf32, #tpu.memory_space<vmem>>, %arg6: memref<1x32xf32, #tpu.memory_space<vmem>>, %arg7: memref<32x2xf32, #tpu.memory_space<vmem>>, %arg8: memref<1x2xf32, #tpu.memory_space<vmem>>, %arg9: memref<8x2xf32, #tpu.memory_space<vmem>>, %arg10: memref<8x128xf32, #tpu.memory_space<vmem>>) attributes {dimension_semantics = [#tpu.dimension_semantics<parallel>, #tpu.dimension_semantics<arbitrary>], iteration_bounds = array<i64: 1, 1>, scalar_prefetch = 0 : i64, scratch_operands = 1 : i64, tpu.core_type = #tpu.core_type<tc>, window_params = [{transform_indices = @transform_0, window_bounds = array<i64: 8, 8, 32>}, {pipeline_mode = #tpu.pipeline_mode<synchronous>, transform_indices = @transform_1, window_bounds = array<i64: 32, 128>}, {pipeline_mode = #tpu.pipeline_mode<synchronous>, transform_indices = @transform_2, window_bounds = array<i64: 1, 128>}, {pipeline_mode = #tpu.pipeline_mode<synchronous>, transform_indices = @transform_3, window_bounds = array<i64: 128, 32>}, {pipeline_mode = #tpu.pipeline_mode<synchronous>, transform_indices = @transform_4, window_bounds = array<i64: 1, 32>}, {pipeline_mode = #tpu.pipeline_mode<synchronous>, transform_indices = @transform_5, window_bounds = array<i64: 32, 2>}, {pipeline_mode = #tpu.pipeline_mode<synchronous>, transform_indices = @transform_6, window_bounds = array<i64: 1, 2>}, {transform_indices = @transform_7, window_bounds = array<i64: 8, 2>}]} {
    %c0_i32 = arith.constant 0 : i32
    %0 = arith.cmpi eq, %arg1, %c0_i32 : i32
    %1 = arith.extui %0 : i1 to i32
    %c0_i32_0 = arith.constant 0 : i32
    %2 = arith.cmpi ne, %1, %c0_i32_0 : i32
    scf.if %2 {
      %cst_15 = arith.constant 0xFF800000 : f32
      %20 = vector.broadcast %cst_15 : f32 to vector<8x128xf32>
      %c0_16 = arith.constant 0 : index
      %c0_17 = arith.constant 0 : index
      %21 = vector.load %arg10[%c0_16, %c0_17] : memref<8x128xf32, #tpu.memory_space<vmem>>, vector<8x128xf32>
      tpu.vector_store %arg10[%c0_16, %c0_17], %20 {strides = array<i32>} : memref<8x128xf32, #tpu.memory_space<vmem>>, vector<8x128xf32>,
    } else {
    }
    %c0 = arith.constant 0 : index
    %c0_1 = arith.constant 0 : index
    %c0_2 = arith.constant 0 : index
    %3 = vector.load %arg2[%c0, %c0_1, %c0_2] : memref<8x8x32xbf16, #tpu.memory_space<vmem>>, vector<8x8x32xbf16>
    %4 = vector.shape_cast %3 : vector<8x8x32xbf16> to vector<64x32xbf16>
    %c0_3 = arith.constant 0 : index
    %c0_4 = arith.constant 0 : index
    %5 = vector.load %arg3[%c0_3, %c0_4] : memref<32x128xbf16, #tpu.memory_space<vmem>>, vector<32x128xbf16>
    %cst = arith.constant dense<0.000000e+00> : vector<64x128xf32>
    %6 = tpu.matmul %4, %5, %cst {dimension_numbers = #tpu.dot_dimension_numbers<[1], [0], [0], [1], [0, 0, 1, 1], [], []>} : vector<64x32xbf16>, vector<32x128xbf16>, vector<64x128xf32> -> vector<64x128xf32>
    %c0_5 = arith.constant 0 : index
    %c0_6 = arith.constant 0 : index
    %7 = vector.load %arg4[%c0_5, %c0_6] : memref<1x128xf32, #tpu.memory_space<vmem>>, vector<1x128xf32>
    %8 = vector.broadcast %7 : vector<1x128xf32> to vector<64x128xf32>
    %9 = arith.addf %6, %8 : vector<64x128xf32>
    %cst_7 = arith.constant 0.000000e+00 : f32
    %10 = vector.broadcast %cst_7 : f32 to vector<64x128xf32>
    %11 = arith.maximumf %9, %10 : vector<64x128xf32>
    %12 = vector.shape_cast %11 : vector<64x128xf32> to vector<8x8x128xf32>
    %c0_8 = arith.constant 0 : index
    %c0_9 = arith.constant 0 : index
    %13 = vector.load %arg10[%c0_8, %c0_9] : memref<8x128xf32, #tpu.memory_space<vmem>>, vector<8x128xf32>
    %cst_10 = arith.constant dense<0xFF800000> : vector<8x128xf32>
    %14 = vector.multi_reduction <maximumf>, %12, %cst_10 [1] : vector<8x8x128xf32> to vector<8x128xf32>
    %15 = arith.maximumf %13, %14 : vector<8x128xf32>
    %c0_11 = arith.constant 0 : index
    %c0_12 = arith.constant 0 : index
    %16 = vector.load %arg10[%c0_11, %c0_12] : memref<8x128xf32, #tpu.memory_space<vmem>>, vector<8x128xf32>
    tpu.vector_store %arg10[%c0_11, %c0_12], %15 {strides = array<i32>} : memref<8x128xf32, #tpu.memory_space<vmem>>, vector<8x128xf32>,
    %c0_i32_13 = arith.constant 0 : i32
    %17 = arith.cmpi eq, %arg1, %c0_i32_13 : i32
    %18 = arith.extui %17 : i1 to i32
    %c0_i32_14 = arith.constant 0 : i32
    %19 = arith.cmpi ne, %18, %c0_i32_14 : i32
    scf.if %19 {
      %c0_15 = arith.constant 0 : index
      %c0_16 = arith.constant 0 : index
      %20 = vector.load %arg10[%c0_15, %c0_16] : memref<8x128xf32, #tpu.memory_space<vmem>>, vector<8x128xf32>
      %c0_17 = arith.constant 0 : index
      %c0_18 = arith.constant 0 : index
      %21 = vector.load %arg5[%c0_17, %c0_18] : memref<128x32xf32, #tpu.memory_space<vmem>>, vector<128x32xf32>
      %cst_19 = arith.constant dense<0.000000e+00> : vector<8x32xf32>
      %22 = tpu.matmul %20, %21, %cst_19 {dimension_numbers = #tpu.dot_dimension_numbers<[1], [0], [0], [1], [0, 0, 1, 1], [], []>} : vector<8x128xf32>, vector<128x32xf32>, vector<8x32xf32> -> vector<8x32xf32>
      %c0_20 = arith.constant 0 : index
      %c0_21 = arith.constant 0 : index
      %23 = vector.load %arg6[%c0_20, %c0_21] : memref<1x32xf32, #tpu.memory_space<vmem>>, vector<1x32xf32>
      %24 = vector.broadcast %23 : vector<1x32xf32> to vector<8x32xf32>
      %25 = arith.addf %22, %24 : vector<8x32xf32>
      %cst_22 = arith.constant 0.000000e+00 : f32
      %26 = vector.broadcast %cst_22 : f32 to vector<8x32xf32>
      %27 = arith.maximumf %25, %26 : vector<8x32xf32>
      %c0_23 = arith.constant 0 : index
      %c0_24 = arith.constant 0 : index
      %28 = vector.load %arg7[%c0_23, %c0_24] : memref<32x2xf32, #tpu.memory_space<vmem>>, vector<32x2xf32>
      %cst_25 = arith.constant dense<0.000000e+00> : vector<8x2xf32>
      %29 = tpu.matmul %27, %28, %cst_25 {dimension_numbers = #tpu.dot_dimension_numbers<[1], [0], [0], [1], [0, 0, 1, 1], [], []>} : vector<8x32xf32>, vector<32x2xf32>, vector<8x2xf32> -> vector<8x2xf32>
      %c0_26 = arith.constant 0 : index
      %c0_27 = arith.constant 0 : index
      %30 = vector.load %arg8[%c0_26, %c0_27] : memref<1x2xf32, #tpu.memory_space<vmem>>, vector<1x2xf32>
      %31 = vector.broadcast %30 : vector<1x2xf32> to vector<8x2xf32>
      %32 = arith.addf %29, %31 : vector<8x2xf32>
      %33 = arith.negf %32 : vector<8x2xf32>
      %34 = math.exp %33 : vector<8x2xf32>
      %cst_28 = arith.constant 1.000000e+00 : f32
      %35 = vector.broadcast %cst_28 : f32 to vector<8x2xf32>
      %36 = arith.addf %35, %34 : vector<8x2xf32>
      %37 = arith.divf %35, %36 : vector<8x2xf32>
      %c0_29 = arith.constant 0 : index
      %c0_30 = arith.constant 0 : index
      %38 = vector.load %arg9[%c0_29, %c0_30] : memref<8x2xf32, #tpu.memory_space<vmem>>, vector<8x2xf32>
      tpu.vector_store %arg9[%c0_29, %c0_30], %37 {strides = array<i32>} : memref<8x2xf32, #tpu.memory_space<vmem>>, vector<8x2xf32>,
    } else {
    }
    return
  }
  func.func @transform_0(%arg0: i32, %arg1: i32) -> (i32, i32, i32) {
    %c0_i32 = arith.constant 0 : i32
    %c0_i32_0 = arith.constant 0 : i32
    return %arg0, %arg1, %c0_i32 : i32, i32, i32
  }
  func.func @transform_1(%arg0: i32, %arg1: i32) -> (i32, i32) {
    %c0_i32 = arith.constant 0 : i32
    %c0_i32_0 = arith.constant 0 : i32
    %c0_i32_1 = arith.constant 0 : i32
    return %c0_i32, %c0_i32_0 : i32, i32
  }
  func.func @transform_2(%arg0: i32, %arg1: i32) -> (i32, i32) {
    %c0_i32 = arith.constant 0 : i32
    %c0_i32_0 = arith.constant 0 : i32
    %c0_i32_1 = arith.constant 0 : i32
    return %c0_i32, %c0_i32_0 : i32, i32
  }
  func.func @transform_3(%arg0: i32, %arg1: i32) -> (i32, i32) {
    %c0_i32 = arith.constant 0 : i32
    %c0_i32_0 = arith.constant 0 : i32
    %c0_i32_1 = arith.constant 0 : i32
    return %c0_i32, %c0_i32_0 : i32, i32
  }
  func.func @transform_4(%arg0: i32, %arg1: i32) -> (i32, i32) {
    %c0_i32 = arith.constant 0 : i32
    %c0_i32_0 = arith.constant 0 : i32
    %c0_i32_1 = arith.constant 0 : i32
    return %c0_i32, %c0_i32_0 : i32, i32
  }
  func.func @transform_5(%arg0: i32, %arg1: i32) -> (i32, i32) {
    %c0_i32 = arith.constant 0 : i32
    %c0_i32_0 = arith.constant 0 : i32
    %c0_i32_1 = arith.constant 0 : i32
    return %c0_i32, %c0_i32_0 : i32, i32
  }
  func.func @transform_6(%arg0: i32, %arg1: i32) -> (i32, i32) {
    %c0_i32 = arith.constant 0 : i32
    %c0_i32_0 = arith.constant 0 : i32
    %c0_i32_1 = arith.constant 0 : i32
    return %c0_i32, %c0_i32_0 : i32, i32
  }
  func.func @transform_7(%arg0: i32, %arg1: i32) -> (i32, i32) {
    %c0_i32 = arith.constant 0 : i32
    %c0_i32_0 = arith.constant 0 : i32
    return %arg0, %c0_i32 : i32, i32
  }
}

</mosaic_0001>

<bundles_post_ra>
// kernel: cnn_multitask_forward.1
= control target key start
LH: loop header
LB: loop body
LE: loop exit
PB: predicated region body
PF: predicated region fallthrough
CT: control target
= control target key end

     0   :  { %v581_v1 = vmov 0.0|0.0   ;;  %vm83_vm0 = vcmask 261120   ;;  %vm582_vm1 = vmmov 0   ;;  %v583_v31 = vmov 0.0   ;;  %s729_s1 = inlined_call_operand.vmem [shape: bf16[32,128], index: 1, kind: input, shape index: {}]   ;;  %s730_s0 = inlined_call_operand.vmem [shape: bf16[8,8,32], index: 0, kind: input, shape index: {}]   ;;  %s731_s3 = inlined_call_operand.vmem [shape: f32[128,32], index: 3, kind: input, shape index: {}]   ;;  %s732_s5 = inlined_call_operand.vmem [shape: f32[32,2], index: 5, kind: input, shape index: {}]   ;;  %s733_s2 = inlined_call_operand.vmem [shape: f32[1,128], index: 2, kind: input, shape index: {}]   ;;  %s734_s4 = inlined_call_operand.vmem [shape: f32[1,32], index: 4, kind: input, shape index: {}]   ;;  %s735_s6 = inlined_call_operand.vmem [shape: f32[1,2], index: 6, kind: input, shape index: {}]   ;;  %s736_s7 = inlined_call_operand.vmem [shape: f32[8,2], index: 7, kind: output, shape index: {}]  }
   0x1   :  { %v571_v0 = vld [vmem:[%s729_s1] sm:$0xff]   ;;  %538 = vmatprep.subr.bf16.mxu1 %v581_v1  ;;  %v572_v2 = vld [vmem:[%s729_s1 + $0x8] sm:$0xff]   ;;  %v575_v5 = vld [vmem:[%s730_s0 + $0x10] sm:$0xff]   ;;  %524 = vmatprep.mubr.msk.f32.mxu1 %vm582_vm1, %v583_v31  ;;  %vm226_vm2 = vcmask 1041409   ;;  %vm228_vm3 = vcmask 1042434   ;;  %vm230_vm4 = vcmask 1043459  }
   0x2   :  { %480 = vmatprep.subr.bf16.mxu0 %v571_v0  ;;  %v573_v3 = vld [vmem:[%s730_s0] sm:$0xff]   ;;  %v574_v4 = vld [vmem:[%s730_s0 + $0x8] sm:$0xff]   ;;  %v576_v6 = vld [vmem:[%s730_s0 + $0x18] sm:$0xff]   ;;  %vm232_vm5 = vcmask 1044484   ;;  %vm234_vm6 = vcmask 1045509   ;;  %vm236_vm7 = vcmask 1046534  }
   0x3   :  { %481 = vmatpush3.bf16.msra.mxu0 %v571_v0  ;;  %484 = vmatprep.mubr.msk.bf16.mxu0 %vm83_vm0, %v573_v3  ;;  %v247_v7 = vld [vmem:[%s731_s3] sm:$0xff]  ;;  %v248_v8 = vld [vmem:[%s731_s3 + $0x8] sm:$0xff]  ;;  %v249_v10 = vld [vmem:[%s731_s3 + $0x10] sm:$0xff]  ;;  %vm238_vm8 = vcmask 1047559   ;;  %vm431_vm9 = vcmask 15360  }
   0x4   :  { %482 = vmatprep.subr.bf16.mxu0 %v572_v2  ;;  %v539_v9 = vpack.c.bf16 %v248_v8, %v247_v7  ;;  %v250_v11 = vld [vmem:[%s731_s3 + $0x18] sm:$0xff]  ;;  %v251_v13 = vld [vmem:[%s731_s3 + $0x20] sm:$0xff]  ;;  %v252_v14 = vld [vmem:[%s731_s3 + $0x28] sm:$0xff] }
   0x5   :  { %v542_v12 = vpack.c.bf16 %v250_v11, %v249_v10  ;;  %v545_v15 = vpack.c.bf16 %v252_v14, %v251_v13  ;;  %v253_v16 = vld [vmem:[%s731_s3 + $0x30] sm:$0xff]  ;;  %v254_v17 = vld [vmem:[%s731_s3 + $0x38] sm:$0xff]  ;;  %v255_v19 = vld [vmem:[%s731_s3 + $0x40] sm:$0xff] }
   0x6   :  { %540 = vmatpush3.bf16.msra.mxu1 %v539_v9  ;;  %v548_v18 = vpack.c.bf16 %v254_v17, %v253_v16  ;;  %v256_v20 = vld [vmem:[%s731_s3 + $0x48] sm:$0xff]  ;;  %v257_v22 = vld [vmem:[%s731_s3 + $0x50] sm:$0xff]  ;;  %v258_v23 = vld [vmem:[%s731_s3 + $0x58] sm:$0xff] }
   0x7   :  { %483 = vmatpush3.bf16.msra.mxu0 %v572_v2  ;;  %541 = vmatprep.subr.bf16.mxu1 %v581_v1  ;;  %v551_v21 = vpack.c.bf16 %v256_v20, %v255_v19  ;;  %v554_v24 = vpack.c.bf16 %v258_v23, %v257_v22  ;;  %v259_v25 = vld [vmem:[%s731_s3 + $0x60] sm:$0xff]  ;;  %v260_v26 = vld [vmem:[%s731_s3 + $0x68] sm:$0xff]  ;;  %v261_v28 = vld [vmem:[%s731_s3 + $0x70] sm:$0xff] }
   0x8   :  { %562 = vmatprep.subr.bf16.mxu0 %v581_v1  ;;  %v557_v27 = vpack.c.bf16 %v260_v26, %v259_v25  ;;  %v262_v29 = vld [vmem:[%s731_s3 + $0x78] sm:$0xff]  ;;  %v341_v32 = vld [vmem:[%s732_s5] sm:$0xff]  ;;  %v342_v33 = vld [vmem:[%s732_s5 + $0x8] sm:$0xff] }
   0x9   :  { %v560_v30 = vpack.c.bf16 %v262_v29, %v261_v28  ;;  %v343_v34 = vld [vmem:[%s732_s5 + $0x10] sm:$0xff]  ;;  %v563_v35 = vpack.c.bf16 %v342_v33, %v341_v32  ;;  %v344_v36 = vld [vmem:[%s732_s5 + $0x18] sm:$0xff]  ;;  %v437_v38 = vld [vmem:[%s733_s2] ss:$0 sm:$0xff] }
   0xa   :  { %485 = vmatmul.mubr.msk.bf16.vlgmr.msra.gmra.mrb[0].mxu0 %vm83_vm0, %v574_v4  ;;  %543 = vmatpush3.bf16.msra.mxu1 %v542_v12  ;;  %v566_v37 = vpack.c.bf16 %v344_v36, %v343_v34 }
   0xb   :  { %488 = vmatprep.mubr.msk.bf16.mxu0 %vm83_vm0, %v575_v5  ;;  %544 = vmatprep.subr.bf16.mxu1 %v581_v1 }
   0xc   :  { %564 = vmatpush3.bf16.msra.mxu0 %v563_v35 }
   0xd   :  { %565 = vmatprep.subr.bf16.mxu0 %v581_v1 }
   0xe   :  { %546 = vmatpush3.bf16.msra.mxu1 %v545_v15 }
   0xf   :  { %547 = vmatprep.subr.bf16.mxu1 %v581_v1 }
  0x10   :  { %567 = vmatpush3.bf16.msra.mxu0 %v566_v37 }
  0x12   :  { %489 = vmatmul.mubr.msk.bf16.gmra.mrb[4].mxu0 %vm83_vm0, %v576_v6  ;;  %549 = vmatpush3.bf16.msra.mxu1 %v548_v18 }
  0x13   :  { %550 = vmatprep.subr.bf16.mxu1 %v581_v1  ;;  %535 = vmatprep.mubr.msk.f32.mxu0 %vm582_vm1, %v583_v31 }
  0x16   :  { %552 = vmatpush3.bf16.msra.mxu1 %v551_v21 }
  0x17   :  { %553 = vmatprep.subr.bf16.mxu1 %v581_v1 }
  0x1a   :  { %555 = vmatpush3.bf16.msra.mxu1 %v554_v24 }
  0x1b   :  { %556 = vmatprep.subr.bf16.mxu1 %v581_v1 }
  0x1e   :  { %558 = vmatpush3.bf16.msra.mxu1 %v557_v27 }
  0x1f   :  { %559 = vmatprep.subr.bf16.mxu1 %v581_v1 }
  0x22   :  { %561 = vmatpush3.bf16.msra.mxu1 %v560_v30 }
  0xdd   :  { %v486_v39 = vpop.f32.mrb[0].mxu0 }
  0xde   :  { %v139_v40 = vadd.f32 %v486_v39, %v437_v38  ;;  %v130_v41 = vpop.f32.mrb[1].mxu0 }
  0xdf   :  { %v131_v42 = vadd.f32 %v437_v38, %v130_v41  ;;  %v487_v43 = vpop.f32.mrb[2].mxu0 }
  0xe0   :  { %v163_v44 = vmax.f32 %v139_v40, 0.0  ;;  %v142_v45 = vadd.f32 %v487_v43, %v437_v38  ;;  %v133_v46 = vpop.f32.mrb[3].mxu0 }
  0xe1   :  { %v161_v47 = vmax.f32 %v131_v42, 0.0  ;;  %v134_v48 = vadd.f32 %v437_v38, %v133_v46 }
  0xe2   :  { %v182_v49 = vrot.slane %v163_v44, 4  ;;  %v164_v50 = vmax.f32 %v142_v45, 0.0 }
  0xe3   :  { %v170_v51 = vrot.slane %v161_v47, 4  ;;  %v162_v52 = vmax.f32 %v134_v48, 0.0 }
  0xe4   :  { %v183_v53 = vmax.f32 %v163_v44, %v182_v49  ;;  %v188_v54 = vrot.slane %v164_v50, 4 }
  0xe5   :  { %v171_v55 = vmax.f32 %v161_v47, %v170_v51  ;;  %v176_v56 = vrot.slane %v162_v52, 4  ;;  %v490_v57 = vpop.f32.mrb[4].mxu0 }
  0xe6   :  { %v184_v58 = vrot.slane %v183_v53, 2  ;;  %v189_v59 = vmax.f32 %v164_v50, %v188_v54  ;;  %v155_v60 = vadd.f32 %v490_v57, %v437_v38  ;;  %v146_v61 = vpop.f32.mrb[5].mxu0  ;;  %v448_v54 = vld [vmem:[%s734_s4] ss:$0 sm:$0xff] }
  0xe7   :  { %v172_v62 = vrot.slane %v171_v55, 2  ;;  %v177_v63 = vmax.f32 %v162_v52, %v176_v56  ;;  %v147_v0 = vadd.f32 %v437_v38, %v146_v61  ;;  %v491_v1 = vpop.f32.mrb[6].mxu0 }
  0xe8   :  { %v185_v2 = vmax.f32 %v183_v53, %v184_v58  ;;  %v190_v3 = vrot.slane %v189_v59, 2  ;;  %v167_v4 = vmax.f32 %v155_v60, 0.0  ;;  %v158_v5 = vadd.f32 %v491_v1, %v437_v38  ;;  %v149_v6 = vpop.f32.mrb[7].mxu0 }
  0xe9   :  { %v173_v7 = vmax.f32 %v171_v55, %v172_v62  ;;  %v178_v8 = vrot.slane %v177_v63, 2  ;;  %v165_v9 = vmax.f32 %v147_v0, 0.0  ;;  %v150_v10 = vadd.f32 %v437_v38, %v149_v6 }
  0xea   :  { %v191_v11 = vmax.f32 %v189_v59, %v190_v3  ;;  %v206_v12 = vrot.slane %v167_v4, 4  ;;  %v168_v13 = vmax.f32 %v158_v5, 0.0  ;;  %v186_v18 = vrot.slane %v185_v2, 1  ;;  %v449_v59 = vld [vmem:[%s735_s6] ss:$0 sm:$0xff] }
  0xeb   :  { %v174_v14 = vrot.slane %v173_v7, 1  ;;  %v179_v15 = vmax.f32 %v177_v63, %v178_v8  ;;  %v194_v16 = vrot.slane %v165_v9, 4  ;;  %v166_v17 = vmax.f32 %v150_v10, 0.0 }
  0xec   :  { %v207_v19 = vmax.f32 %v167_v4, %v206_v12  ;;  %v212_v20 = vrot.slane %v168_v13, 4  ;;  %v192_v21 = vrot.slane %v191_v11, 1  ;;  %v187_v31 = vmax.f32 %v185_v2, %v186_v18 }
  0xed   :  { %v180_v22 = vrot.slane %v179_v15, 1  ;;  %v195_v23 = vmax.f32 %v165_v9, %v194_v16  ;;  %v200_v24 = vrot.slane %v166_v17, 4  ;;  %v175_v27 = vmax.f32 %v173_v7, %v174_v14 }
  0xee   :  { %v208_v25 = vrot.slane %v207_v19, 2  ;;  %v213_v26 = vmax.f32 %v168_v13, %v212_v20  ;;  %v193_v34 = vmax.f32 %v191_v11, %v192_v21 }
  0xef   :  { %v181_v28 = vmax.f32 %v179_v15, %v180_v22  ;;  %v196_v29 = vrot.slane %v195_v23, 2  ;;  %v201_v30 = vmax.f32 %v166_v17, %v200_v24 }
  0xf0   :  { %v209_v32 = vmax.f32 %v207_v19, %v208_v25  ;;  %v214_v33 = vrot.slane %v213_v26, 2 }
  0xf1   :  { %v227_v35 = vsel %vm226_vm2, %v181_v28, %v175_v27  ;;  %v197_v36 = vmax.f32 %v195_v23, %v196_v29  ;;  %v202_v37 = vrot.slane %v201_v30, 2 }
  0xf2   :  { %v215_v38 = vmax.f32 %v213_v26, %v214_v33  ;;  %v229_v39 = vsel %vm228_vm3, %v187_v31, %v227_v35  ;;  %v210_v43 = vrot.slane %v209_v32, 1 }
  0xf3   :  { %v198_v40 = vrot.slane %v197_v36, 1  ;;  %v203_v41 = vmax.f32 %v201_v30, %v202_v37  ;;  %v231_v42 = vsel %vm230_vm4, %v193_v34, %v229_v39 }
  0xf4   :  { %v216_v45 = vrot.slane %v215_v38, 1  ;;  %v211_v49 = vmax.f32 %v209_v32, %v210_v43 }
  0xf5   :  { %v199_v44 = vmax.f32 %v197_v36, %v198_v40  ;;  %v204_v46 = vrot.slane %v203_v41, 1 }
  0xf6   :  { %v217_v50 = vmax.f32 %v215_v38, %v216_v45 }
  0xf7   :  { %v205_v47 = vmax.f32 %v203_v41, %v204_v46  ;;  %v233_v48 = vsel %vm232_vm5, %v199_v44, %v231_v42 }
  0xf9   :  { %v235_v51 = vsel %vm234_vm6, %v205_v47, %v233_v48 }
  0xfa   :  { %v237_v52 = vsel %vm236_vm7, %v211_v49, %v235_v51 }
  0xfb   :  { %v239_v53 = vsel %vm238_vm8, %v217_v50, %v237_v52 }
  0xfc   :  { %525 = vmatmul.mubr.f32.vlgmr.msra.gmra.mrb[0].mxu1 %v239_v53 }
 0x1cf   :  { %v336_v55 = vpop.f32.mrb[0].mxu1 }
 0x1d0   :  { %v337_v56 = vadd.f32 %v448_v54, %v336_v55  ;;  %v526_v57 = vpop.f32.mrb[1].mxu1 }
 0x1d2   :  { %v340_v58 = vmax.f32 %v337_v56, 0.0 }
 0x1d4   :  { %536 = vmatmul.mubr.msk.f32.vlgmr.msra.gmra.mrb[8].mxu0 %vm83_vm0, %v340_v58 }
 0x2a7   :  { %v421_v60 = vpop.f32.mrb[8].mxu0 }
 0x2a8   :  { %v422_v61 = vadd.f32 %v449_v59, %v421_v60  ;;  %v537_v62 = vpop.f32.mrb[9].mxu0 }
 0x2aa   :  { %v451_v63 = vmul.f32 -1.442695, %v422_v61 }
 0x2ac   :  { %577 = vpow2.f32 %v451_v63 }
 0x2b6   :  { %v578_v0 = vpop.eup %577 }
 0x2b7   :  { %v428_v1 = vadd.f32 1.0, %v578_v0 }
 0x2b9   :  { %579 = vrcp.f32 %v428_v1 }
 0x2c3   :  { %v580_v2 = vpop.eup %579 }
 0x2c4   :  { %432 = vst.msk [vmem:[%s736_s7] sm:$0xff] %vm431_vm9, %v580_v2 }

</bundles_post_ra>
